<compile_context>
chip_gen: v6e
topology: v6e:2x2x1
jax: 0.10.0
libtpu: 0.0.40
codegen_flags: <defaults>
</compile_context>

<pallas_src>
import math

import jax
import jax.numpy as jnp
from jax.experimental import pallas as pl
from jax.experimental.pallas import tpu as pltpu


_DEFAULT_MIN_KERNEL_BYTES = 1 << 20      # below this, XLA's fused add wins
_VMEM_LIMIT_BYTES = 32 * 1024 * 1024     # fits v5e/v6e (128 MiB phys) and v7x (64 MiB phys)


def _pe_add_kernel(x_ref, pe_ref, o_ref):
    # x/o block: (1, TM, 128); pe block: (TM, 128) broadcasts over the leading 1.
    o_ref[...] = x_ref[...] + pe_ref[...]


def make_positional_encoding(d_model, max_len=5000, dtype=jnp.float32):
    """Build the pe buffer exactly like the PyTorch __init__ (incl. the
    .type(torch.LongTensor) truncation quirk).  Assumes even d_model, like the
    original module.  Build it in the model dtype (e.g. bf16) so the forward
    pass needs no extra slice/cast pass over HBM."""
    position = jnp.arange(0.0, max_len, dtype=jnp.float32)[:, None]          # (max_len, 1)
    div_term = jnp.exp(
        jnp.arange(0.0, d_model, 2, dtype=jnp.float32) * -(math.log(10000.0) / d_model)
    )                                                                         # (d_model/2,)
    # torch .type(torch.LongTensor) truncates toward zero; the assignment back
    # into a float tensor re-floats it.
    sin_part = jnp.trunc(jnp.sin(position * div_term)).astype(dtype)
    cos_part = jnp.trunc(jnp.cos(position * div_term)).astype(dtype)
    pe = jnp.zeros((max_len, d_model), dtype=dtype)
    pe = pe.at[:, 0::2].set(sin_part)
    pe = pe.at[:, 1::2].set(cos_part)
    return pe                                                                 # (max_len, d_model)


def _sublane_multiple(itemsize):
    # Native sublane packing: 8 rows for 4-byte, 16 for 2-byte, 32 for 1-byte.
    return 8 * max(1, 4 // int(itemsize))


def _target_block_bytes():
    """~2 MiB x-blocks on v5e (16 MiB default scoped VMEM), ~4 MiB elsewhere.
    Steady-state pipeline footprint ~= 2x x-block + 2x out-block + 1x pe-block."""
    try:
        kind = jax.devices()[0].device_kind.lower()
    except Exception:
        return 2 << 20
    if "v5" in kind and ("lite" in kind or "5e" in kind):
        return 2 << 20
    return 4 << 20


def _tile_rows(num_rows, row_bytes, sublane, target_bytes):
    """Row tile sized for ~target_bytes per x block.  Returns either a multiple
    of `sublane` or the full extent (both are legal (8,128)-aligned blocks).
    When everything fits in one block, split into two so the row-tile grid axis
    gives v7x's two TensorCores something to shard."""
    tile = max(1, target_bytes // max(1, row_bytes))
    if tile >= num_rows:
        if num_rows >= 2 * sublane:
            half = -(-num_rows // 2)                      # ceil(num_rows/2)
            half = -(-half // sublane) * sublane          # round up to sublane multiple
            if half < num_rows:
                return half
        return num_rows
    return max(sublane, (tile // sublane) * sublane)


def _make_pe_spec(tile_m, n, single_buffer):
    index_map = lambda m, b: (m, 0)
    if single_buffer:
        try:
            # pe's block index changes only once per B inner grid steps, so
            # single-buffering it is nearly free and halves its VMEM share.
            return pl.BlockSpec((tile_m, n), index_map, pipeline_mode=pl.Buffered(1))
        except TypeError:
            pass  # older jax without pipeline_mode; fall through to default.
    return pl.BlockSpec((tile_m, n), index_map)


def _pe_add_call(x3, pe2, tile_m, single_buffer_pe=True):
    """x3: (B, M, 128); pe2: (P, 128) with P >= M.  Returns x3 + pe2[:M][None]."""
    B, M, N = x3.shape
    grid = (pl.cdiv(M, tile_m), B)          # batch innermost: pe tile stays resident
    return pl.pallas_call(
        _pe_add_kernel,
        out_shape=jax.ShapeDtypeStruct((B, M, N), x3.dtype),
        grid=grid,
        in_specs=[
            pl.BlockSpec((1, tile_m, N), lambda m, b: (b, m, 0)),
            _make_pe_spec(tile_m, N, single_buffer_pe),
        ],
        out_specs=pl.BlockSpec((1, tile_m, N), lambda m, b: (b, m, 0)),
        # Pure in-place add.  Caller must donate x for the alias to elide the
        # second B*S*D HBM buffer (jax.jit donate_argnums); otherwise XLA
        # inserts a defensive copy.
        input_output_aliases={0: 0},
        compiler_params=pltpu.CompilerParams(
            dimension_semantics=("parallel", "parallel"),
            vmem_limit_bytes=_VMEM_LIMIT_BYTES,
        ),
    )(x3, pe2)


def positional_encoding_forward(x, pe, dropout_p=0.1, training=False,
                                min_kernel_bytes=_DEFAULT_MIN_KERNEL_BYTES):
    """x: (B, S, D); pe: (max_len, D) from make_positional_encoding.
    Returns x + pe[:S] (dropout is identity in eval mode)."""
    B, S, D = x.shape
    itemsize = jnp.dtype(x.dtype).itemsize
    total_bytes = B * S * D * itemsize
    lane_dense = (S * D) % 128 == 0

    if (not lane_dense) or total_bytes < min_kernel_bytes:
        # Tiny tensors: launch + per-step overhead dominates.  Non-lane-dense
        # shapes: a D<128 lane axis forces masked vst.msk partial stores (the
        # biggest mem-bound penalty), so XLA's fused add wins.  Either way,
        # plain jnp is the right call.
        out = x + pe[:S].astype(x.dtype)[None, :, :]
    else:
        # Lane-dense layout: fold (S, D) so the trailing dim is exactly 128
        # lanes -> full-width unmasked stores even when D < 128.
        M = (S * D) // 128
        sublane = _sublane_multiple(itemsize)
        tile_m = _tile_rows(M, 128 * itemsize, sublane, _target_block_bytes())

        if pe.dtype == x.dtype and pe.size % 128 == 0 and tile_m % sublane == 0:
            # No wrapper-side slice/cast pass over HBM: pass the full
            # lane-dense pe view; the index_map only touches the first
            # ceil(M/tile_m) row tiles, so unused pe rows are never DMA'd.
            pe2 = pe.reshape(-1, 128)
        else:
            pe2 = pe[:S].astype(x.dtype).reshape(M, 128)

        x3 = x.reshape(B, M, 128)
        try:
            out3 = _pe_add_call(x3, pe2, tile_m, single_buffer_pe=True)
        except Exception:
            # Fallback if Buffered(1) on the pe spec is rejected by this
            # jax/Mosaic version; identical numerics, just double-buffered pe.
            out3 = _pe_add_call(x3, pe2, tile_m, single_buffer_pe=False)
        out = out3.reshape(B, S, D)

    # TODO(synk): nn.Dropout is identity in eval mode; training-mode dropout
    # (pltpu.prng_seed + prng_random_bits + 1/(1-p) rescale fused into the add
    # kernel) is intentionally not emulated here.
    return out


if __name__ == "__main__":
    key = jax.random.PRNGKey(0)
    k1, k2, k3, k4, k5 = jax.random.split(key, 5)

    def _check(x, pe, **kw):
        # Reference computed first (independent of any in-place aliasing).
        ref = x + pe[: x.shape[1]].astype(x.dtype)[None, :, :]
        out = jax.block_until_ready(positional_encoding_forward(x, pe, **kw))
        assert out.shape == x.shape and out.dtype == x.dtype
        assert jnp.allclose(out.astype(jnp.float32), ref.astype(jnp.float32),
                            atol=1e-6), "mismatch vs reference"

    # 1) Module-sized tiny input (batch=2, seq=8, d_model=32): plain jnp fast
    #    path (kernel overhead would dominate at 2 KiB).
    x_small = jax.random.normal(k1, (2, 8, 32), dtype=jnp.float32)
    pe_small = make_positional_encoding(32, max_len=64)
    _check(x_small, pe_small)

    # 2) Lane-dense Pallas path, f32, full-pe view (no wrapper slice/cast).
    x_lane = jax.random.normal(k2, (2, 128, 64), dtype=jnp.float32)
    pe_lane = make_positional_encoding(64, max_len=256)
    _check(x_lane, pe_lane, min_kernel_bytes=0)   # force the kernel path

    # 3) Lane-dense Pallas path, bf16 (sublane multiple 16, pe built in bf16).
    x_bf16 = jax.random.normal(k3, (2, 256, 64), dtype=jnp.bfloat16)
    pe_bf16 = make_positional_encoding(64, max_len=256, dtype=jnp.bfloat16)
    _check(x_bf16, pe_bf16, min_kernel_bytes=0)

    # 4) Lane-dense Pallas path with a pe-dtype mismatch (exercises the
    #    slice+cast fallback inside the wrapper).
    x_mix = jax.random.normal(k4, (2, 128, 64), dtype=jnp.bfloat16)
    _check(x_mix, pe_lane, min_kernel_bytes=0)

    # 5) Non-lane-dense shape (S*D % 128 != 0): must take the plain jnp path
    #    (no masked-lane Pallas kernel is ever emitted).
    x_odd = jax.random.normal(k5, (2, 10, 36), dtype=jnp.float32)
    pe_odd = make_positional_encoding(36, max_len=64)
    _check(x_odd, pe_odd, min_kernel_bytes=0)

    print("KERNEL_OK")
</pallas_src>

<mosaic_0001>
module attributes {stable_mosaic.version = 11 : i64} {
  func.func @_pe_add_kernel(%arg0: i32, %arg1: i32, %arg2: memref<1x32x128xf32, #tpu.memory_space<vmem>>, %arg3: memref<32x128xf32, #tpu.memory_space<vmem>>, %arg4: memref<1x32x128xf32, #tpu.memory_space<vmem>>) attributes {dimension_semantics = [#tpu.dimension_semantics<parallel>, #tpu.dimension_semantics<parallel>], iteration_bounds = array<i64: 2, 2>, scalar_prefetch = 0 : i64, scratch_operands = 0 : i64, tpu.core_type = #tpu.core_type<tc>, window_params = [{transform_indices = @transform_0, window_bounds = array<i64: 1, 32, 128>}, {pipeline_mode = #tpu.pipeline_mode<synchronous>, transform_indices = @transform_1, window_bounds = array<i64: 32, 128>}, {transform_indices = @transform_2, window_bounds = array<i64: 1, 32, 128>}]} {
    %c0 = arith.constant 0 : index
    %c0_0 = arith.constant 0 : index
    %c0_1 = arith.constant 0 : index
    %0 = vector.load %arg2[%c0, %c0_0, %c0_1] : memref<1x32x128xf32, #tpu.memory_space<vmem>>, vector<1x32x128xf32>
    %c0_2 = arith.constant 0 : index
    %c0_3 = arith.constant 0 : index
    %1 = vector.load %arg3[%c0_2, %c0_3] : memref<32x128xf32, #tpu.memory_space<vmem>>, vector<32x128xf32>
    %2 = vector.shape_cast %1 : vector<32x128xf32> to vector<1x32x128xf32>
    %3 = arith.addf %0, %2 : vector<1x32x128xf32>
    %c0_4 = arith.constant 0 : index
    %c0_5 = arith.constant 0 : index
    %c0_6 = arith.constant 0 : index
    %4 = vector.load %arg4[%c0_4, %c0_5, %c0_6] : memref<1x32x128xf32, #tpu.memory_space<vmem>>, vector<1x32x128xf32>
    tpu.vector_store %arg4[%c0_4, %c0_5, %c0_6], %3 {strides = array<i32>} : memref<1x32x128xf32, #tpu.memory_space<vmem>>, vector<1x32x128xf32>,
    return
  }
  func.func @transform_0(%arg0: i32, %arg1: i32) -> (i32, i32, i32) {
    %c0_i32 = arith.constant 0 : i32
    %c0_i32_0 = arith.constant 0 : i32
    return %arg1, %arg0, %c0_i32 : i32, i32, i32
  }
  func.func @transform_1(%arg0: i32, %arg1: i32) -> (i32, i32) {
    %c0_i32 = arith.constant 0 : i32
    %c0_i32_0 = arith.constant 0 : i32
    return %arg0, %c0_i32 : i32, i32
  }
  func.func @transform_2(%arg0: i32, %arg1: i32) -> (i32, i32, i32) {
    %c0_i32 = arith.constant 0 : i32
    %c0_i32_0 = arith.constant 0 : i32
    return %arg1, %arg0, %c0_i32 : i32, i32, i32
  }
}

module attributes {stable_mosaic.version = 11 : i64} {
  func.func @_pe_add_kernel(%arg0: i32, %arg1: i32, %arg2: memref<1x32x128xf32, #tpu.memory_space<vmem>>, %arg3: memref<32x128xf32, #tpu.memory_space<vmem>>, %arg4: memref<1x32x128xf32, #tpu.memory_space<vmem>>) attributes {dimension_semantics = [#tpu.dimension_semantics<parallel>, #tpu.dimension_semantics<parallel>], iteration_bounds = array<i64: 2, 2>, scalar_prefetch = 0 : i64, scratch_operands = 0 : i64, tpu.core_type = #tpu.core_type<tc>, window_params = [{transform_indices = @transform_0, window_bounds = array<i64: 1, 32, 128>}, {transform_indices = @transform_1, window_bounds = array<i64: 32, 128>}, {transform_indices = @transform_2, window_bounds = array<i64: 1, 32, 128>}]} {
    %c0 = arith.constant 0 : index
    %c0_0 = arith.constant 0 : index
    %c0_1 = arith.constant 0 : index
    %0 = vector.load %arg2[%c0, %c0_0, %c0_1] : memref<1x32x128xf32, #tpu.memory_space<vmem>>, vector<1x32x128xf32>
    %c0_2 = arith.constant 0 : index
    %c0_3 = arith.constant 0 : index
    %1 = vector.load %arg3[%c0_2, %c0_3] : memref<32x128xf32, #tpu.memory_space<vmem>>, vector<32x128xf32>
    %2 = vector.shape_cast %1 : vector<32x128xf32> to vector<1x32x128xf32>
    %3 = arith.addf %0, %2 : vector<1x32x128xf32>
    %c0_4 = arith.constant 0 : index
    %c0_5 = arith.constant 0 : index
    %c0_6 = arith.constant 0 : index
    %4 = vector.load %arg4[%c0_4, %c0_5, %c0_6] : memref<1x32x128xf32, #tpu.memory_space<vmem>>, vector<1x32x128xf32>
    tpu.vector_store %arg4[%c0_4, %c0_5, %c0_6], %3 {strides = array<i32>} : memref<1x32x128xf32, #tpu.memory_space<vmem>>, vector<1x32x128xf32>,
    return
  }
  func.func @transform_0(%arg0: i32, %arg1: i32) -> (i32, i32, i32) {
    %c0_i32 = arith.constant 0 : i32
    %c0_i32_0 = arith.constant 0 : i32
    return %arg1, %arg0, %c0_i32 : i32, i32, i32
  }
  func.func @transform_1(%arg0: i32, %arg1: i32) -> (i32, i32) {
    %c0_i32 = arith.constant 0 : i32
    %c0_i32_0 = arith.constant 0 : i32
    return %arg0, %c0_i32 : i32, i32
  }
  func.func @transform_2(%arg0: i32, %arg1: i32) -> (i32, i32, i32) {
    %c0_i32 = arith.constant 0 : i32
    %c0_i32_0 = arith.constant 0 : i32
    return %arg1, %arg0, %c0_i32 : i32, i32, i32
  }
}

</mosaic_0001>

<bundles_post_ra>
// kernel: tpu_custom_call.1
= control target key start
LH: loop header
LB: loop body
LE: loop exit
PB: predicated region body
PF: predicated region fallthrough
CT: control target
= control target key end

     0   :  { %7 = vsyncpa [#allocation3], 0  ;;  %s758_s0 = inlined_call_operand.hbm [shape: f32[2,64,128], index: 0, kind: input, shape index: {}, may-alias: {0,2}]   ;;  %s759_s1 = inlined_call_operand.vmem [shape: f32[128,128], index: 1, kind: input, shape index: {}]   ;;  %s760_s2 = inlined_call_operand.hbm [shape: f32[2,64,128], index: 2, kind: output, shape index: {}, may-alias: {0,2}]  }
   0x1   :  { %9 = vsyncpa [#allocation3 + $0x1], 0 }
   0x2   :  { %10 = vsyncpa [#allocation4], 0 }
   0x3   :  { %12 = vsyncpa [#allocation4 + $0x1], 0  ;;  %s589_s9 = smov 0   ;;  %s591_s10 = smov 0  }
   0x4   :  { %s593_s11 = smov 0   ;;  %s595_s12 = smov 0  }
   0x5   :  { %s597_s13 = smov 0   ;;  %s599_s14 = smov 0  }
   0x6   :  { %s601_s15 = smov 0   ;;  %s603_s16 = smov 0  }
   0x7 LB: > { %s341_s17 = sadd.s32 4294967295, %s566_s16   ;;  %s342_s18 = sadd.s32 4294967294, %s566_s16   ;;  %s566_s16 = sphi %s603_s16, %s18_s16   ;;  %s562_s15 = sphi %s601_s15, %s775_s15   ;;  %s558_s14 = sphi %s599_s14, %s774_s14   ;;  %s554_s13 = sphi %s597_s13, %s773_s13   ;;  %s550_s12 = sphi %s595_s12, %s772_s12   ;;  %s546_s11 = sphi %s593_s11, %s771_s11   ;;  %s542_s10 = sphi %s591_s10, %s770_s10   ;;  %s538_s9 = sphi %s589_s9, %s769_s9  }
   0x8   : > { %s27_s19 = sadd.s32 1, %s558_s14  ;;  %s30_s20 = sadd.s32 1, %s562_s15 }
   0x9   : > { %p28_p0 = scmp.ge.s32.totalorder %s27_s19, 2  ;;  %s39_s21 = sadd.s32 1, %s546_s11 }
   0xa   : > { %p46_p1 = scmp.ne.s32.totalorder %s546_s11, %s542_s10  ;;  %p47_p2 = scmp.eq.s32.totalorder %s566_s16, 0 }
   0xb   : > { %s777_s19 = smov (%p28_p0, %s27_s19), 0  ;;  %s779_s20 = smov (!%p28_p0, %s30_s20), %s562_s15 }
   0xc   : > { %s34_s22 = ssub.s32 %s558_s14, %s777_s19  ;;  %p642_p3 = por %p47_p2, %p46_p1 }
   0xd   : > { %p32_p4 = scmp.ge.s32.totalorder %s779_s20, 2  ;;  %p52_p5 = scmp.ne.s32.totalorder %s542_s10, %s538_s9 }
   0xe   : > { %p53_p6 = scmp.eq.s32.totalorder %s341_s17, 0  ;;  %p104_p7 = scmp.eq.s32.totalorder %s341_s17, 3 }
   0xf   : > { %s781_s20 = smov (%p32_p4, %s779_s20), 0  ;;  %p110_p10 = scmp.eq.s32.totalorder %s342_s18, 3 }
  0x10   : > { %763 = sst [smem:[#allocation8_spill]] %s781_s20  ;;  %p650_p8 = por %p53_p6, %p52_p5 }
  0x11   : > { %p654_p9 = por %p104_p7, %p46_p1  ;;  %s35_s26 = ssub.s32 %s562_s15, %s781_s20 }
  0x12   : > { %s36_s27 = sor.u32 %s35_s26, %s34_s22  ;;  %p660_p12 = por %p110_p10, %p52_p5 }
  0x13   : > { %p37_p11 = scmp.eq.s32.totalorder %s36_s27, 0  ;;  %p372_p13 = scmp.lt.s32.totalorder %s566_s16, 4 }
  0x14   : > { %s139_s29 = sand.u32 1, %s546_s11   ;;  %s346_s4 = sshll.u32 %s562_s15, 2 }
  0x15   : > { %s667_s30 = scalar_select %p37_p11, %s546_s11, %s39_s21  }
  0x16   : > { %s345_s3 = sshll.u32 %s139_s29, 5  ;;  %s347_s5 = sshll.u32 %s558_s14, 3 }
  0x17   : > { %s143_s6 = scalar_lea.vmem [#allocation2], %s345_s3  ;;  %s149_s8 = sadd.s32 %s347_s5, %s346_s4 }
  0x18   : > { %s152_s7 = sshll.u32 %s143_s6, 4  ;;  %s348_s17 = sshll.u32 %s149_s8, 7  ;;  %s153_s7 = int_to_ptr.vmem [resolvable:$true] %s152_s7 }
  0x19   : > { %p673_p0 = pnand %p372_p13, %p642_p3  ;;  %s151_s27 = scalar_lea.hbm %s758_s0, %s348_s17 }
  0x1a   : > { %s140_s21 = scalar_lea.sflag [#allocation3], %s139_s29  ;;  %s455_s20 = scalar_lea.vmem %s153_s7, 512 }
  0x1b   : > { %p444_p1 = pneg %p673_p0  ;;  %p456_p2 = scmp.ne.s32.totalorder %s153_s7, %s455_s20 }
  0x1c   : > { %s568_s3 = smov [#allocation2]  }
  0x1d   : > { %p458_p4 = pnand %p456_p2, %p444_p1  ;;  %s460_s4 = sshll.u32 %s568_s3, 4  ;;  %s461_s4 = int_to_ptr.vmem [resolvable:$false] %s460_s4 }
  0x1e   : > { %s462_s23 = scalar_lea.vmem %s461_s4, 1024  ;;  %p463_p3 = scmp.lt.s32.totalorder %s153_s7, %s461_s4 }
  0x1f   : > { %p459_p5 = pneg %p458_p4  ;;  %p464_p6 = scmp.lt.s32.totalorder %s462_s23, %s455_s20 }
  0x21   : > { %p465_p7 = por %p464_p6, %p463_p3 }
  0x23   : > { %p466_p10 = pnand %p465_p7, %p459_p5 }
  0x25   : > { %469 = shalt.err (!%p466_p10)
}
  0x26   : > { %s569_s5 = smov 128   ;;  %s570_s29 = smov 8  }
  0x27   : > { %367 = dma.hbm_to_vmem [thread:$0]  (!%p673_p0), %s151_s27, 512, %s153_s7, %s140_s21, %s569_s5, %s569_s5, %s570_s29  }
  0x28   : > { %p349_p11 = scmp.ge.s32.totalorder %s566_s16, 1  ;;  %p160_p13 = scmp.lt.s32.totalorder %s566_s16, 5 }
  0x2a   : > { %p161_p1 = pnand %p349_p11, %p160_p13 }
  0x2b   : > { %s687_s6 = sand.u32 (!%p161_p1), 1, %s542_s10  }
  0x2c   : > { %164 = sbr.rel (%p161_p1) target bundleno = 78 (0x4e), region = 28  ;;  %s350_s20 = sshll.u32 (!%p161_p1), %s687_s6, 5 }
  0x2d   : > { %s167_s8 = scalar_lea.sflag (!%p161_p1), [#allocation3], %s687_s6  ;;  %s170_s17 = scalar_lea.vmem (!%p161_p1), [#allocation2], %s350_s20 }
  0x31   : > { %529 = dma.done.wait (%p650_p8), %s167_s8, 512  }
  0x32   : > { %531 = vsyncadd (%p650_p8), %s167_s8, 4294966784  ;;  %s352_s7 = sshll.u32 %s554_s13, 2  ;;  %s356_s18 = sshll.u32 %s550_s12, 3  ;;  %v204_v0 = vld [vmem:[%s170_s17] sm:$0xff]  ;;  %v205_v2 = vld [vmem:[%s170_s17 + $0x8] sm:$0xff] }
  0x33   : > { %p198_p0 = scmp.lt.s32.totalorder %s352_s7, 15  ;;  %s233_s22 = sadd.s32 %s356_s18, %s352_s7  ;;  %v206_v5 = vld [vmem:[%s170_s17 + $0x10] sm:$0xff]  ;;  %v207_v9 = vld [vmem:[%s170_s17 + $0x18] sm:$0xff] }
  0x34   : > { %s195_s27 = scalar_lea.vmem [#allocation5], %s350_s20  ;;  %s357_s5 = sshll.u32 %s233_s22, 7 }
  0x35   : > { %s783_s7 = smov (!%p198_p0, %s352_s7), 15  ;;  %s236_s21 = sshll.u32 %s195_s27, 4  ;;  %s700_s21 = int_to_ptr.vmem [resolvable:$true] %s236_s21 }
  0x36   : > { %s353_s26 = sshll.u32 %s783_s7, 3  ;;  %s705_s24 = scalar_lea.hbm %s760_s2, %s357_s5 }
  0x37   : > { %s201_s23 = scalar_lea.vmem %s759_s1, %s353_s26  ;;  %s221_s29 = scalar_lea.sflag [#allocation4], %s687_s6 }
  0x38   : > { %v208_v1 = vld [vmem:[%s201_s23] sm:$0xff]  ;;  %v209_v4 = vld [vmem:[%s201_s23 + $0x8] sm:$0xff]  ;;  %v210_v6 = vld [vmem:[%s201_s23 + $0x10] sm:$0xff]  ;;  %s470_s20 = scalar_lea.vmem %s700_s21, 512  ;;  %s571_s8 = smov [#allocation5]  }
  0x39   : > { %v212_v3 = vadd.f32 %v208_v1, %v204_v0  ;;  %v213_v7 = vadd.f32 %v209_v4, %v205_v2  ;;  %v214_v8 = vadd.f32 %v210_v6, %v206_v5  ;;  %v211_v10 = vld [vmem:[%s201_s23 + $0x18] sm:$0xff]  ;;  %p471_p8 = scmp.ne.s32.totalorder %s700_s21, %s470_s20  ;;  %s474_s7 = sshll.u32 %s571_s8, 4  ;;  %s475_s7 = int_to_ptr.vmem [resolvable:$false] %s474_s7 }
  0x3a   : > { %v215_v11 = vadd.f32 %v211_v10, %v207_v9  ;;  %s476_s18 = scalar_lea.vmem %s475_s7, 1024  ;;  %p477_p5 = scmp.lt.s32.totalorder %s700_s21, %s475_s7 }
  0x3b   : > { %216 = vst [vmem:[%s195_s27] sm:$0xff] %v212_v3  ;;  %217 = vst [vmem:[%s195_s27 + $0x8] sm:$0xff] %v213_v7  ;;  %p472_p2 = pnand %p471_p8, %p654_p9  ;;  %p478_p3 = scmp.lt.s32.totalorder %s476_s18, %s470_s20 }
  0x3c   : > { %218 = vst [vmem:[%s195_s27 + $0x10] sm:$0xff] %v214_v8  ;;  %219 = vst [vmem:[%s195_s27 + $0x18] sm:$0xff] %v215_v11 }
  0x3d   : > { %p473_p4 = pneg %p472_p2  ;;  %p479_p6 = por %p478_p3, %p477_p5 }
  0x3f   : > { %p480_p7 = pnand %p479_p6, %p473_p4 }
  0x41   : > { %483 = shalt.err (!%p480_p7)
}
  0x42   : > { %s484_s17 = scalar_lea.hbm %s705_s24, 512  ;;  %s488_s27 = scalar_lea.hbm %s760_s2, 2048 }
  0x43   : > { %p485_p10 = scmp.ne.s32.totalorder %s705_s24, %s484_s17  ;;  %p489_p1 = scmp.lt.s32.totalorder %s705_s24, %s760_s2 }
  0x44   : > { %p490_p0 = scmp.lt.s32.totalorder %s488_s27, %s484_s17 }
  0x45   : > { %p486_p11 = pnand %p485_p10, %p654_p9 }
  0x46   : > { %p491_p8 = por %p490_p0, %p489_p1 }
  0x47   : > { %p487_p13 = pneg %p486_p11 }
  0x49   : > { %p492_p2 = pnand %p491_p8, %p487_p13 }
  0x4b   : > { %495 = shalt.err (!%p492_p2)
}
  0x4c   : > { %s572_s23 = smov 128   ;;  %s573_s5 = smov 8  }
  0x4d   : > { %362 = dma.vmem_to_hbm [thread:$0]  (%p654_p9), %s700_s21, 512, %s705_s24, %s221_s29, %s572_s23, %s572_s23, %s573_s5  }
  0x4e PF: > { %p373_p4 = scmp.ge.s32.totalorder %s566_s16, 2  ;;  %s251_s12 = sand.u32 1, %s538_s9  }
  0x4f   : > { %s252_s13 = scalar_lea.sflag [#allocation4], %s251_s12 }
  0x50   : > { %p369_p5 = pnand %p373_p4, %p660_p12 }
  0x52   : > { %p370_p3 = pneg %p369_p5 }
  0x54   : > { %533 = dma.done.wait (%p370_p3), %s252_s13, 512  }
  0x55   : > { %535 = vsyncadd (%p370_p3), %s252_s13, 4294966784  ;;  %s18_s16 = sadd.s32 1, %s566_s16   ;;  %s768_s25 = sld [smem:[#allocation8_spill]] }
  0x56   : > { %p15_p6 = scmp.ge.s32.totalorder %s18_s16, 6   ;;  %s769_s9 = smov %s542_s10 }
  0x57   : > { %s770_s10 = smov %s546_s11  ;;  %s771_s11 = smov %s667_s30 }
  0x58   : > { %s772_s12 = smov %s558_s14  ;;  %s773_s13 = smov %s562_s15 }
  0x59   : > { %s774_s14 = smov %s777_s19  ;;  %17 = sbr.rel (!%p15_p6) target bundleno = 7 (0x7), region = 76 }
  0x5b   : > { %s775_s15 = smov %s768_s25 }
  0x5e   :  { %257 = vsyncpa [#allocation3], 1 }
  0x5f   :  { %259 = vsyncpa [#allocation3 + $0x1], 1 }
  0x60   :  { %260 = vsyncpa [#allocation4], 1 }
  0x61   :  { %262 = vsyncpa [#allocation4 + $0x1], 1 }

// kernel: tpu_custom_call.1
= control target key start
LH: loop header
LB: loop body
LE: loop exit
PB: predicated region body
PF: predicated region fallthrough
CT: control target
= control target key end

     0   :  { %7 = vsyncpa [#allocation3], 0  ;;  %s755_s0 = inlined_call_operand.hbm [shape: f32[2,64,128], index: 0, kind: input, shape index: {}, may-alias: {0,2}]   ;;  %s756_s1 = inlined_call_operand.vmem [shape: f32[128,128], index: 1, kind: input, shape index: {}]   ;;  %s757_s2 = inlined_call_operand.hbm [shape: f32[2,64,128], index: 2, kind: output, shape index: {}, may-alias: {0,2}]  }
   0x1   :  { %9 = vsyncpa [#allocation3 + $0x1], 0 }
   0x2   :  { %10 = vsyncpa [#allocation4], 0 }
   0x3   :  { %12 = vsyncpa [#allocation4 + $0x1], 0  ;;  %s586_s9 = smov 0   ;;  %s588_s10 = smov 0  }
   0x4   :  { %s590_s11 = smov 0   ;;  %s592_s12 = smov 0  }
   0x5   :  { %s594_s13 = smov 0   ;;  %s596_s14 = smov 0  }
   0x6   :  { %s598_s15 = smov 0   ;;  %s600_s16 = smov 0  }
   0x7 LB: > { %s338_s17 = sadd.s32 4294967295, %s563_s16   ;;  %s339_s18 = sadd.s32 4294967294, %s563_s16   ;;  %s563_s16 = sphi %s600_s16, %s18_s16   ;;  %s559_s15 = sphi %s598_s15, %s772_s15   ;;  %s555_s14 = sphi %s596_s14, %s771_s14   ;;  %s551_s13 = sphi %s594_s13, %s770_s13   ;;  %s547_s12 = sphi %s592_s12, %s769_s12   ;;  %s543_s11 = sphi %s590_s11, %s768_s11   ;;  %s539_s10 = sphi %s588_s10, %s767_s10   ;;  %s535_s9 = sphi %s586_s9, %s766_s9  }
   0x8   : > { %s27_s19 = sadd.s32 1, %s555_s14  ;;  %s30_s20 = sadd.s32 1, %s559_s15 }
   0x9   : > { %p28_p0 = scmp.ge.s32.totalorder %s27_s19, 2  ;;  %s39_s21 = sadd.s32 1, %s543_s11 }
   0xa   : > { %p46_p1 = scmp.ne.s32.totalorder %s543_s11, %s539_s10  ;;  %p47_p2 = scmp.eq.s32.totalorder %s563_s16, 0 }
   0xb   : > { %s774_s19 = smov (%p28_p0, %s27_s19), 0  ;;  %s776_s20 = smov (!%p28_p0, %s30_s20), %s559_s15 }
   0xc   : > { %s34_s22 = ssub.s32 %s555_s14, %s774_s19  ;;  %p639_p3 = por %p47_p2, %p46_p1 }
   0xd   : > { %p32_p4 = scmp.ge.s32.totalorder %s776_s20, 2  ;;  %p52_p5 = scmp.ne.s32.totalorder %s539_s10, %s535_s9 }
   0xe   : > { %p53_p6 = scmp.eq.s32.totalorder %s338_s17, 0  ;;  %p104_p7 = scmp.eq.s32.totalorder %s338_s17, 3 }
   0xf   : > { %s778_s20 = smov (%p32_p4, %s776_s20), 0  ;;  %p110_p10 = scmp.eq.s32.totalorder %s339_s18, 3 }
  0x10   : > { %760 = sst [smem:[#allocation8_spill]] %s778_s20  ;;  %p647_p8 = por %p53_p6, %p52_p5 }
  0x11   : > { %p651_p9 = por %p104_p7, %p46_p1  ;;  %s35_s26 = ssub.s32 %s559_s15, %s778_s20 }
  0x12   : > { %s36_s27 = sor.u32 %s35_s26, %s34_s22  ;;  %p657_p12 = por %p110_p10, %p52_p5 }
  0x13   : > { %p37_p11 = scmp.eq.s32.totalorder %s36_s27, 0  ;;  %p369_p13 = scmp.lt.s32.totalorder %s563_s16, 4 }
  0x14   : > { %s130_s29 = sand.u32 1, %s543_s11   ;;  %s343_s4 = sshll.u32 %s559_s15, 2 }
  0x15   : > { %s664_s30 = scalar_select %p37_p11, %s543_s11, %s39_s21  }
  0x16   : > { %s342_s3 = sshll.u32 %s130_s29, 5  ;;  %s344_s5 = sshll.u32 %s555_s14, 3 }
  0x17   : > { %s134_s6 = scalar_lea.vmem [#allocation2], %s342_s3  ;;  %s140_s8 = sadd.s32 %s344_s5, %s343_s4 }
  0x18   : > { %s143_s7 = sshll.u32 %s134_s6, 4  ;;  %s345_s17 = sshll.u32 %s140_s8, 7  ;;  %s144_s7 = int_to_ptr.vmem [resolvable:$true] %s143_s7 }
  0x19   : > { %p670_p0 = pnand %p369_p13, %p639_p3  ;;  %s142_s27 = scalar_lea.hbm %s755_s0, %s345_s17 }
  0x1a   : > { %s131_s21 = scalar_lea.sflag [#allocation3], %s130_s29  ;;  %s452_s20 = scalar_lea.vmem %s144_s7, 512 }
  0x1b   : > { %p441_p1 = pneg %p670_p0  ;;  %p453_p2 = scmp.ne.s32.totalorder %s144_s7, %s452_s20 }
  0x1c   : > { %s565_s3 = smov [#allocation2]  }
  0x1d   : > { %p455_p4 = pnand %p453_p2, %p441_p1  ;;  %s457_s4 = sshll.u32 %s565_s3, 4  ;;  %s458_s4 = int_to_ptr.vmem [resolvable:$false] %s457_s4 }
  0x1e   : > { %s459_s23 = scalar_lea.vmem %s458_s4, 1024  ;;  %p460_p3 = scmp.lt.s32.totalorder %s144_s7, %s458_s4 }
  0x1f   : > { %p456_p5 = pneg %p455_p4  ;;  %p461_p6 = scmp.lt.s32.totalorder %s459_s23, %s452_s20 }
  0x21   : > { %p462_p7 = por %p461_p6, %p460_p3 }
  0x23   : > { %p463_p10 = pnand %p462_p7, %p456_p5 }
  0x25   : > { %466 = shalt.err (!%p463_p10)
}
  0x26   : > { %s566_s5 = smov 128   ;;  %s567_s29 = smov 8  }
  0x27   : > { %364 = dma.hbm_to_vmem [thread:$0]  (!%p670_p0), %s142_s27, 512, %s144_s7, %s131_s21, %s566_s5, %s566_s5, %s567_s29  }
  0x28   : > { %p346_p11 = scmp.ge.s32.totalorder %s563_s16, 1  ;;  %p160_p13 = scmp.lt.s32.totalorder %s563_s16, 5 }
  0x2a   : > { %p161_p1 = pnand %p346_p11, %p160_p13 }
  0x2b   : > { %s684_s6 = sand.u32 (!%p161_p1), 1, %s539_s10  }
  0x2c   : > { %164 = sbr.rel (%p161_p1) target bundleno = 78 (0x4e), region = 28  ;;  %s347_s20 = sshll.u32 (!%p161_p1), %s684_s6, 5 }
  0x2d   : > { %s167_s8 = scalar_lea.sflag (!%p161_p1), [#allocation3], %s684_s6  ;;  %s170_s17 = scalar_lea.vmem (!%p161_p1), [#allocation2], %s347_s20 }
  0x31   : > { %526 = dma.done.wait (%p647_p8), %s167_s8, 512  }
  0x32   : > { %528 = vsyncadd (%p647_p8), %s167_s8, 4294966784  ;;  %s349_s7 = sshll.u32 %s551_s13, 2  ;;  %s353_s18 = sshll.u32 %s547_s12, 3  ;;  %v204_v0 = vld [vmem:[%s170_s17] sm:$0xff]  ;;  %v205_v2 = vld [vmem:[%s170_s17 + $0x8] sm:$0xff] }
  0x33   : > { %p198_p0 = scmp.lt.s32.totalorder %s349_s7, 15  ;;  %s233_s22 = sadd.s32 %s353_s18, %s349_s7  ;;  %v206_v5 = vld [vmem:[%s170_s17 + $0x10] sm:$0xff]  ;;  %v207_v9 = vld [vmem:[%s170_s17 + $0x18] sm:$0xff] }
  0x34   : > { %s195_s27 = scalar_lea.vmem [#allocation5], %s347_s20  ;;  %s354_s5 = sshll.u32 %s233_s22, 7 }
  0x35   : > { %s780_s7 = smov (!%p198_p0, %s349_s7), 15  ;;  %s236_s21 = sshll.u32 %s195_s27, 4  ;;  %s697_s21 = int_to_ptr.vmem [resolvable:$true] %s236_s21 }
  0x36   : > { %s350_s26 = sshll.u32 %s780_s7, 3  ;;  %s702_s24 = scalar_lea.hbm %s757_s2, %s354_s5 }
  0x37   : > { %s201_s23 = scalar_lea.vmem %s756_s1, %s350_s26  ;;  %s221_s29 = scalar_lea.sflag [#allocation4], %s684_s6 }
  0x38   : > { %v208_v1 = vld [vmem:[%s201_s23] sm:$0xff]  ;;  %v209_v4 = vld [vmem:[%s201_s23 + $0x8] sm:$0xff]  ;;  %v210_v6 = vld [vmem:[%s201_s23 + $0x10] sm:$0xff]  ;;  %s467_s20 = scalar_lea.vmem %s697_s21, 512  ;;  %s568_s8 = smov [#allocation5]  }
  0x39   : > { %v212_v3 = vadd.f32 %v208_v1, %v204_v0  ;;  %v213_v7 = vadd.f32 %v209_v4, %v205_v2  ;;  %v214_v8 = vadd.f32 %v210_v6, %v206_v5  ;;  %v211_v10 = vld [vmem:[%s201_s23 + $0x18] sm:$0xff]  ;;  %p468_p8 = scmp.ne.s32.totalorder %s697_s21, %s467_s20  ;;  %s471_s7 = sshll.u32 %s568_s8, 4  ;;  %s472_s7 = int_to_ptr.vmem [resolvable:$false] %s471_s7 }
  0x3a   : > { %v215_v11 = vadd.f32 %v211_v10, %v207_v9  ;;  %s473_s18 = scalar_lea.vmem %s472_s7, 1024  ;;  %p474_p5 = scmp.lt.s32.totalorder %s697_s21, %s472_s7 }
  0x3b   : > { %216 = vst [vmem:[%s195_s27] sm:$0xff] %v212_v3  ;;  %217 = vst [vmem:[%s195_s27 + $0x8] sm:$0xff] %v213_v7  ;;  %p469_p2 = pnand %p468_p8, %p651_p9  ;;  %p475_p3 = scmp.lt.s32.totalorder %s473_s18, %s467_s20 }
  0x3c   : > { %218 = vst [vmem:[%s195_s27 + $0x10] sm:$0xff] %v214_v8  ;;  %219 = vst [vmem:[%s195_s27 + $0x18] sm:$0xff] %v215_v11 }
  0x3d   : > { %p470_p4 = pneg %p469_p2  ;;  %p476_p6 = por %p475_p3, %p474_p5 }
  0x3f   : > { %p477_p7 = pnand %p476_p6, %p470_p4 }
  0x41   : > { %480 = shalt.err (!%p477_p7)
}
  0x42   : > { %s481_s17 = scalar_lea.hbm %s702_s24, 512  ;;  %s485_s27 = scalar_lea.hbm %s757_s2, 2048 }
  0x43   : > { %p482_p10 = scmp.ne.s32.totalorder %s702_s24, %s481_s17  ;;  %p486_p1 = scmp.lt.s32.totalorder %s702_s24, %s757_s2 }
  0x44   : > { %p487_p0 = scmp.lt.s32.totalorder %s485_s27, %s481_s17 }
  0x45   : > { %p483_p11 = pnand %p482_p10, %p651_p9 }
  0x46   : > { %p488_p8 = por %p487_p0, %p486_p1 }
  0x47   : > { %p484_p13 = pneg %p483_p11 }
  0x49   : > { %p489_p2 = pnand %p488_p8, %p484_p13 }
  0x4b   : > { %492 = shalt.err (!%p489_p2)
}
  0x4c   : > { %s569_s23 = smov 128   ;;  %s570_s5 = smov 8  }
  0x4d   : > { %359 = dma.vmem_to_hbm [thread:$0]  (%p651_p9), %s697_s21, 512, %s702_s24, %s221_s29, %s569_s23, %s569_s23, %s570_s5  }
  0x4e PF: > { %p370_p4 = scmp.ge.s32.totalorder %s563_s16, 2  ;;  %s251_s12 = sand.u32 1, %s535_s9  }
  0x4f   : > { %s252_s13 = scalar_lea.sflag [#allocation4], %s251_s12 }
  0x50   : > { %p366_p5 = pnand %p370_p4, %p657_p12 }
  0x52   : > { %p367_p3 = pneg %p366_p5 }
  0x54   : > { %530 = dma.done.wait (%p367_p3), %s252_s13, 512  }
  0x55   : > { %532 = vsyncadd (%p367_p3), %s252_s13, 4294966784  ;;  %s18_s16 = sadd.s32 1, %s563_s16   ;;  %s765_s25 = sld [smem:[#allocation8_spill]] }
  0x56   : > { %p15_p6 = scmp.ge.s32.totalorder %s18_s16, 6   ;;  %s766_s9 = smov %s539_s10 }
  0x57   : > { %s767_s10 = smov %s543_s11  ;;  %s768_s11 = smov %s664_s30 }
  0x58   : > { %s769_s12 = smov %s555_s14  ;;  %s770_s13 = smov %s559_s15 }
  0x59   : > { %s771_s14 = smov %s774_s19  ;;  %17 = sbr.rel (!%p15_p6) target bundleno = 7 (0x7), region = 76 }
  0x5b   : > { %s772_s15 = smov %s765_s25 }
  0x5e   :  { %257 = vsyncpa [#allocation3], 1 }
  0x5f   :  { %259 = vsyncpa [#allocation3 + $0x1], 1 }
  0x60   :  { %260 = vsyncpa [#allocation4], 1 }
  0x61   :  { %262 = vsyncpa [#allocation4 + $0x1], 1 }

</bundles_post_ra>
